<compile_context>
chip_gen: v7x
topology: tpu7x:2x2x1
jax: 0.10.0
libtpu: 0.0.40
codegen_flags: <defaults>
</compile_context>

<pallas_src>
import jax
import jax.numpy as jnp
from jax.experimental import pallas as pl
from jax.experimental.pallas import tpu as pltpu

C, H, W = 3, 64, 64
FLAT = C * H * W                 # 12288
LANE = 768                       # 6 * 128 lanes
ROWS_PER_IMAGE = FLAT // LANE    # 16 rows / image -> sublane extent % 16 == 0
TINY_BYTES = 1 << 20             # below this, skip Pallas (dispatch dominates)


def _cast_kernel(x_ref, o_ref):
    # Elementwise load + cast to float32 + store (the hot path of .float()).
    o_ref[...] = x_ref[...].astype(jnp.float32)


def _round_up(x, m):
    return -(-x // m) * m


def _device_tuning():
    """Per-generation (tile_rows_max, vmem_limit_bytes, prefer_even_steps).

    Conservative fallback = v7x budget (64 MiB VMEM / TC, 2 TCs)."""
    tile_rows_max, vmem_limit, even_steps = 2048, 40 << 20, True
    try:
        info = pltpu.get_tpu_info()
        vmem_bytes = int(getattr(info, "vmem_capacity_bytes", 64 << 20))
        if vmem_bytes >= (100 << 20):        # v5e / v6e: 128 MiB VMEM, 1 TC
            tile_rows_max, vmem_limit, even_steps = 4096, 64 << 20, False
    except Exception:
        pass
    return tile_rows_max, vmem_limit, even_steps


def _pick_tile_rows(rows, tile_rows_max, even_steps):
    """Maximize the tile, keep ~2-4 steps (VMEM cap wins for large inputs).

    rows is always a multiple of 16 (rows = 16 * n_images)."""
    n_units = rows // ROWS_PER_IMAGE                  # 16-row units available
    # Steps forced by the VMEM cap, but aim for ~4 (>=2) so pipeline overlap
    # and the megacore split still happen; never more steps than units.
    steps = max(pl.cdiv(rows, tile_rows_max), min(4, n_units), 1)
    if even_steps and steps > 1 and steps % 2 == 1 and steps < n_units:
        steps += 1                                    # even split across 2 TCs
    # Round the STEP COUNT, not the tile, so the last block isn't a sliver.
    tile_rows = _round_up(pl.cdiv(rows, steps), ROWS_PER_IMAGE)
    return max(ROWS_PER_IMAGE, min(tile_rows, tile_rows_max))


def _make_in_spec(tile_rows, deep_input_buffer):
    if deep_input_buffer and hasattr(pl, "Buffered"):
        try:
            return pl.BlockSpec((tile_rows, LANE), lambda i: (i, 0),
                                pipeline_mode=pl.Buffered(3))
        except TypeError:
            pass
    return pl.BlockSpec((tile_rows, LANE), lambda i: (i, 0))


def _cast_pallas(x2d, rows, tile_rows, vmem_limit, deep_input_buffer):
    in_bytes = jnp.dtype(x2d.dtype).itemsize
    cost = pl.CostEstimate(
        flops=0,
        transcendentals=0,
        bytes_accessed=rows * LANE * (in_bytes + 4),
    )
    return pl.pallas_call(
        _cast_kernel,
        out_shape=jax.ShapeDtypeStruct((rows, LANE), jnp.float32),
        grid=(pl.cdiv(rows, tile_rows),),
        in_specs=[_make_in_spec(tile_rows, deep_input_buffer)],
        out_specs=pl.BlockSpec((tile_rows, LANE), lambda i: (i, 0)),
        compiler_params=pltpu.CompilerParams(
            dimension_semantics=("parallel",),
            vmem_limit_bytes=vmem_limit,
        ),
        cost_estimate=cost,
    )(x2d)


def animal_student_forward(x, *, force_pallas=False):
    """Reproduces AnimalStudentNet.forward: x.contiguous().view(-1,3,64,64).float()."""
    n = x.size // FLAT
    assert n * FLAT == x.size, "input size must be a multiple of 3*64*64"

    # Fast path: already float32 -> .float() is a no-op, view is pure layout.
    if x.dtype == jnp.float32 and not force_pallas:
        return jnp.reshape(x, (n, C, H, W))

    rows = n * ROWS_PER_IMAGE
    total_bytes = rows * LANE * (jnp.dtype(x.dtype).itemsize + 4)
    # Fast path: tiny input -> kernel dispatch + pipeline warmup would dominate;
    # let XLA fuse/elide the cast into the consumer.
    if total_bytes < TINY_BYTES and not force_pallas:
        return jnp.reshape(x, (n, C, H, W)).astype(jnp.float32)

    # .contiguous().view(...) -> pure layout; lane-dense 2-D slab.
    x2d = jnp.reshape(x, (rows, LANE))
    tile_rows_max, vmem_limit, even_steps = _device_tuning()
    tile_rows = _pick_tile_rows(rows, tile_rows_max, even_steps)

    try:
        out2d = _cast_pallas(x2d, rows, tile_rows, vmem_limit, True)
    except Exception:
        # Retry without the deeper input pipeline (pl.Buffered(3)).
        out2d = _cast_pallas(x2d, rows, tile_rows, vmem_limit, False)

    # Final NCHW view (pure layout).
    return jnp.reshape(out2d, (n, C, H, W))


if __name__ == "__main__":
    key = jax.random.PRNGKey(0)
    key_small, key_med = jax.random.split(key)

    # Small deterministic input consistent with the module: (2, 3, 64, 64),
    # bf16 so the .float() cast is meaningful.
    x_small = jax.random.normal(key_small, (2, C, H, W), dtype=jnp.bfloat16)
    ref_small = jnp.reshape(x_small, (-1, C, H, W)).astype(jnp.float32)

    # 1) Force the Pallas kernel (batch=2 would otherwise take the tiny-input
    #    fast path).
    out = jax.block_until_ready(animal_student_forward(x_small, force_pallas=True))
    assert out.shape == (2, C, H, W) and out.dtype == jnp.float32
    assert jnp.array_equal(out, ref_small)

    # 2) Default path for the tiny input (fused XLA cast fast path).
    out_fast = jax.block_until_ready(animal_student_forward(x_small))
    assert jnp.array_equal(out_fast, ref_small)

    # 3) float32 input -> pure reshape fast path.
    x_f32 = ref_small.reshape(-1)
    out_f32 = jax.block_until_ready(animal_student_forward(x_f32))
    assert out_f32.shape == (2, C, H, W) and jnp.array_equal(out_f32, ref_small)

    # 4) Multi-tile Pallas run through the default path (batch=32 -> 4 steps).
    x_med = jax.random.normal(key_med, (32, C, H, W), dtype=jnp.bfloat16)
    out_med = jax.block_until_ready(animal_student_forward(x_med))
    ref_med = jnp.reshape(x_med, (-1, C, H, W)).astype(jnp.float32)
    assert out_med.shape == (32, C, H, W) and jnp.array_equal(out_med, ref_med)

    print("KERNEL_OK")
</pallas_src>

<mosaic_0001>
module attributes {stable_mosaic.version = 11 : i64} {
  func.func @_cast_kernel(%arg0: i32, %arg1: memref<16x768xbf16, #tpu.memory_space<vmem>>, %arg2: memref<16x768xf32, #tpu.memory_space<vmem>>) attributes {dimension_semantics = [#tpu.dimension_semantics<parallel>], iteration_bounds = array<i64: 2>, scalar_prefetch = 0 : i64, scratch_operands = 0 : i64, tpu.core_type = #tpu.core_type<tc>, window_params = [{transform_indices = @transform_0, window_bounds = array<i64: 16, 768>}, {transform_indices = @transform_1, window_bounds = array<i64: 16, 768>}]} {
    %c0 = arith.constant 0 : index
    %c0_0 = arith.constant 0 : index
    %0 = vector.load %arg1[%c0, %c0_0] : memref<16x768xbf16, #tpu.memory_space<vmem>>, vector<16x768xbf16>
    %1 = arith.extf %0 : vector<16x768xbf16> to vector<16x768xf32>
    %c0_1 = arith.constant 0 : index
    %c0_2 = arith.constant 0 : index
    %2 = vector.load %arg2[%c0_1, %c0_2] : memref<16x768xf32, #tpu.memory_space<vmem>>, vector<16x768xf32>
    tpu.vector_store %arg2[%c0_1, %c0_2], %1 {strides = array<i32>} : memref<16x768xf32, #tpu.memory_space<vmem>>, vector<16x768xf32>,
    return
  }
  func.func @transform_0(%arg0: i32) -> (i32, i32) {
    %c0_i32 = arith.constant 0 : i32
    %c0_i32_0 = arith.constant 0 : i32
    return %arg0, %c0_i32 : i32, i32
  }
  func.func @transform_1(%arg0: i32) -> (i32, i32) {
    %c0_i32 = arith.constant 0 : i32
    %c0_i32_0 = arith.constant 0 : i32
    return %arg0, %c0_i32 : i32, i32
  }
}

</mosaic_0001>

<bundles_post_ra>
// kernel: tpu_custom_call.1
= control target key start
LH: loop header
LB: loop body
LE: loop exit
PB: predicated region body
PF: predicated region fallthrough
CT: control target
= control target key end

     0   :  { %6 = vsyncpa [#allocation3], 0  ;;  %s594_s0 = inlined_call_operand.hbm [shape: bf16[32,768], index: 0, kind: input, shape index: {}]   ;;  %s595_s1 = inlined_call_operand.hbm [shape: f32[32,768], index: 1, kind: output, shape index: {}]  }
   0x1   :  { %8 = vsyncpa [#allocation3 + $0x1], 0 }
   0x2   :  { %9 = vsyncpa [#allocation4], 0 }
   0x3   :  { %11 = vsyncpa [#allocation4 + $0x1], 0  ;;  %s437_s6 = smov 0   ;;  %s439_s7 = smov 0  }
   0x4   :  { %s441_s8 = smov 0   ;;  %s443_s9 = smov 0  }
   0x5 LB: > { %s458_s10 = sadd.s32 4294967295, %s419_s9   ;;  %s256_s11 = sadd.s32 4294967294, %s419_s9   ;;  %s419_s9 = sphi %s443_s9, %s607_s9   ;;  %s415_s8 = sphi %s441_s8, %s606_s8   ;;  %s411_s7 = sphi %s439_s7, %s605_s7   ;;  %s407_s6 = sphi %s437_s6, %s604_s6  }
   0x6   : > { %s462_s12 = sadd.s32 1, %s419_s9   ;;  %s24_s13 = sadd.s32 1, %s415_s8 }
   0x7   : > { %s21_s14 = ssub.s32 %s419_s9, %s462_s12  ;;  %p31_p0 = scmp.ne.s32.totalorder %s415_s8, %s411_s7 }
   0x8   : > { %p22_p1 = scmp.eq.s32.totalorder %s21_s14, 0  ;;  %p32_p2 = scmp.eq.s32.totalorder %s419_s9, 0 }
   0x9   : > { %p37_p3 = scmp.ne.s32.totalorder %s411_s7, %s407_s6  ;;  %p38_p4 = scmp.eq.s32.totalorder %s458_s10, 0 }
   0xa   : > { %s474_s15 = scalar_select %p22_p1, %s415_s8, %s24_s13  }
   0xb   : > { %p33_p5 = por %p32_p2, %p31_p0  ;;  %p476_p6 = por %p38_p4, %p37_p3 }
   0xc   : > { %p61_p7 = scmp.eq.s32.totalorder %s458_s10, 1  ;;  %p67_p8 = scmp.eq.s32.totalorder %s256_s11, 1 }
   0xd   : > { %p285_p10 = scmp.lt.s32.totalorder %s419_s9, 2  ;;  %s87_s19 = sand.u32 1, %s415_s8  }
   0xe   : > { %p483_p11 = por %p61_p7, %p31_p0  ;;  %p487_p12 = por %p67_p8, %p37_p3 }
   0xf   : > { %s269_s20 = smul.u32 768, %s419_s9  ;;  %p498_p13 = pnand %p285_p10, %p33_p5 }
  0x10   : > { %s598_s17 = scalar_select %p483_p11, 1, 0 }
  0x11   : > { %s599_s18 = scalar_select %p487_p12, 1, 0 }
  0x12   : > { %s268_s21 = smul.u32 48, %s87_s19  ;;  %s496_s24 = scalar_lea.hbm %s594_s0, %s269_s20 }
  0x13   : > { %s504_s28 = scalar_lea.sflag [#allocation3], %s87_s19  ;;  %s323_s29 = scalar_lea.hbm %s496_s24, 768 }
  0x14   : > { %s91_s26 = scalar_lea.vmem [#allocation2], %s268_s21  ;;  %p324_p0 = scmp.ne.s32.totalorder %s496_s24, %s323_s29 }
  0x15   : > { %s99_s27 = sshll.u32 %s91_s26, 4  ;;  %p325_p1 = pneg %p498_p13  ;;  %s502_s27 = int_to_ptr.vmem [resolvable:$true] %s99_s27 }
  0x16   : > { %s328_s3 = scalar_lea.hbm %s594_s0, 1536  ;;  %p329_p4 = scmp.lt.u32.totalorder %s496_s24, %s594_s0 }
  0x17   : > { %p326_p2 = pnand %p325_p1, %p324_p0  ;;  %p330_p5 = scmp.lt.u32.totalorder %s328_s3, %s323_s29 }
  0x18   : > { %p332_p8 = scmp.lt.u32.totalorder %s323_s29, %s496_s24 }
  0x19   : > { %p327_p3 = pneg %p326_p2  ;;  %p331_p7 = por %p330_p5, %p329_p4 }
  0x1b   : > { %p333_p10 = por %p332_p8, %p331_p7 }
  0x1d   : > { %p334_p9 = pnand %p333_p10, %p327_p3 }
  0x1f   : > { %337 = shalt.err (!%p334_p9)
}
  0x20   : > { %s338_s11 = scalar_lea.vmem %s502_s27, 768  ;;  %s421_s13 = smov [#allocation2]  }
  0x21   : > { %p339_p0 = scmp.ne.s32.totalorder %s502_s27, %s338_s11  ;;  %s343_s14 = sshll.u32 %s421_s13, 4  ;;  %s344_s14 = int_to_ptr.vmem [resolvable:$false] %s343_s14 }
  0x22   : > { %s345_s19 = scalar_lea.vmem %s344_s14, 1536  ;;  %p346_p11 = scmp.lt.s32.totalorder %s502_s27, %s344_s14 }
  0x23   : > { %p341_p2 = pnand %p339_p0, %p325_p1  ;;  %p347_p4 = scmp.lt.s32.totalorder %s345_s19, %s338_s11 }
  0x25   : > { %p342_p12 = pneg %p341_p2  ;;  %p348_p5 = por %p347_p4, %p346_p11 }
  0x27   : > { %p349_p7 = pnand %p348_p5, %p342_p12 }
  0x29   : > { %352 = shalt.err (!%p349_p7)
}
  0x2a   : > { %s422_s20 = smov 384   ;;  %s423_s21 = smov 24  }
  0x2b   : > { %280 = dma.hbm_to_vmem [thread:$0]  (!%p498_p13), %s496_s24, 768, %s502_s27, %s504_s28, %s422_s20, %s422_s20, %s423_s21  }
  0x2c   : > { %p262_p9 = scmp.ge.s32.totalorder %s419_s9, 1  ;;  %p107_p1 = scmp.lt.s32.totalorder %s419_s9, 3 }
  0x2e   : > { %p108_p3 = pnand %p262_p9, %p107_p1 }
  0x2f   : > { %s535_s22 = sand.u32 (!%p108_p3), 1, %s411_s7  }
  0x30   : > { %111 = sbr.rel (%p108_p3) target bundleno = 83 (0x53), region = 24  ;;  %s114_s26 = scalar_lea.sflag (!%p108_p3), [#allocation3], %s535_s22 }
  0x31   : > { %s270_s23 = smul.u32 (!%p108_p3), 48, %s535_s22 }
  0x33   : > { %s117_s29 = scalar_lea.vmem (!%p108_p3), [#allocation2], %s270_s23 }
  0x37   : > { %398 = dma.done.wait (%p476_p6), %s114_s26, 768  }
  0x38   : > { %400 = vsyncadd (%p476_p6), %s114_s26, 4294966528  ;;  %s271_s24 = smul.u32 96, %s535_s22  ;;  %v138_v0 = vld [vmem:[%s117_s29] sm:$0xff]  ;;  %v139_v1 = vld [vmem:[%s117_s29 + $0x8] sm:$0xff]  ;;  %s169_s2 = scalar_lea.sflag [#allocation4], %s535_s22 }
  0x39   : > { %s272_s25 = smul.u32 1536, %s458_s10  ;;  %v140_v2 = vld [vmem:[%s117_s29 + $0x10] sm:$0xff]  ;;  %v144_v3 = vunpack.c.l.bf16 %v138_v0  ;;  %v145_v4 = vunpack.c.h.bf16 %v138_v0  ;;  %v146_v5 = vunpack.c.l.bf16 %v139_v1  ;;  %v147_v6 = vunpack.c.h.bf16 %v139_v1  ;;  %v141_v7 = vld [vmem:[%s117_s29 + $0x18] sm:$0xff]  ;;  %v142_v8 = vld [vmem:[%s117_s29 + $0x20] sm:$0xff]  ;;  %p601_p11 = scmp.ne.s32.totalorder %s598_s17, 0 }
  0x3a   : > { %s135_s27 = scalar_lea.vmem [#allocation5], %s271_s24  ;;  %v143_v9 = vld [vmem:[%s117_s29 + $0x28] sm:$0xff]  ;;  %v148_v10 = vunpack.c.l.bf16 %v140_v2  ;;  %v149_v11 = vunpack.c.h.bf16 %v140_v2  ;;  %v150_v12 = vunpack.c.l.bf16 %v141_v7  ;;  %v151_v13 = vunpack.c.h.bf16 %v141_v7  ;;  %s424_s4 = smov [#allocation5]  }
  0x3b   : > { %s183_s28 = sshll.u32 %s135_s27, 4  ;;  %156 = vst [vmem:[%s135_s27] sm:$0xff] %v144_v3  ;;  %157 = vst [vmem:[%s135_s27 + $0x8] sm:$0xff] %v145_v4  ;;  %v152_v14 = vunpack.c.l.bf16 %v142_v8  ;;  %v153_v15 = vunpack.c.h.bf16 %v142_v8  ;;  %v154_v16 = vunpack.c.l.bf16 %v143_v9  ;;  %v155_v17 = vunpack.c.h.bf16 %v143_v9  ;;  %s548_s30 = scalar_lea.hbm %s595_s1, %s272_s25  ;;  %s550_s28 = int_to_ptr.vmem [resolvable:$true] %s183_s28 }
  0x3c   : > { %158 = vst [vmem:[%s135_s27 + $0x10] sm:$0xff] %v146_v5  ;;  %159 = vst [vmem:[%s135_s27 + $0x18] sm:$0xff] %v147_v6  ;;  %s353_s3 = scalar_lea.vmem %s550_s28, 1536  ;;  %s357_s5 = sshll.u32 %s424_s4, 4  ;;  %s358_s5 = int_to_ptr.vmem [resolvable:$false] %s357_s5 }
  0x3d   : > { %160 = vst [vmem:[%s135_s27 + $0x20] sm:$0xff] %v148_v10  ;;  %161 = vst [vmem:[%s135_s27 + $0x28] sm:$0xff] %v149_v11  ;;  %p354_p6 = scmp.ne.s32.totalorder %s550_s28, %s353_s3  ;;  %s359_s11 = scalar_lea.vmem %s358_s5, 3072 }
  0x3e   : > { %162 = vst [vmem:[%s135_s27 + $0x30] sm:$0xff] %v150_v12  ;;  %163 = vst [vmem:[%s135_s27 + $0x38] sm:$0xff] %v151_v13  ;;  %p360_p8 = scmp.lt.s32.totalorder %s550_s28, %s358_s5  ;;  %p361_p10 = scmp.lt.s32.totalorder %s359_s11, %s353_s3 }
  0x3f   : > { %164 = vst [vmem:[%s135_s27 + $0x40] sm:$0xff] %v152_v14  ;;  %165 = vst [vmem:[%s135_s27 + $0x48] sm:$0xff] %v153_v15  ;;  %p355_p12 = pnand %p354_p6, %p601_p11 }
  0x40   : > { %166 = vst [vmem:[%s135_s27 + $0x50] sm:$0xff] %v154_v16  ;;  %167 = vst [vmem:[%s135_s27 + $0x58] sm:$0xff] %v155_v17  ;;  %p362_p0 = por %p361_p10, %p360_p8 }
  0x41   : > { %p356_p13 = pneg %p355_p12 }
  0x43   : > { %p363_p2 = pnand %p362_p0, %p356_p13 }
  0x45   : > { %366 = shalt.err (!%p363_p2)
}
  0x46   : > { %s367_s13 = scalar_lea.hbm %s548_s30, 1536  ;;  %s371_s20 = scalar_lea.hbm %s595_s1, 3072 }
  0x47   : > { %p368_p4 = scmp.ne.s32.totalorder %s548_s30, %s367_s13  ;;  %p372_p9 = scmp.lt.u32.totalorder %s548_s30, %s595_s1 }
  0x48   : > { %p373_p1 = scmp.lt.u32.totalorder %s371_s20, %s367_s13  ;;  %p375_p6 = scmp.lt.u32.totalorder %s367_s13, %s548_s30 }
  0x49   : > { %p369_p5 = pnand %p368_p4, %p601_p11 }
  0x4a   : > { %p374_p3 = por %p373_p1, %p372_p9 }
  0x4b   : > { %p370_p7 = pneg %p369_p5 }
  0x4c   : > { %p376_p12 = por %p375_p6, %p374_p3 }
  0x4e   : > { %p377_p13 = pnand %p376_p12, %p370_p7 }
  0x50   : > { %380 = shalt.err (!%p377_p13)
}
  0x51   : > { %s425_s26 = smov 768   ;;  %s426_s29 = smov 48  }
  0x52   : > { %275 = dma.vmem_to_hbm [thread:$0]  (%p601_p11), %s550_s28, 1536, %s548_s30, %s169_s2, %s425_s26, %s425_s26, %s426_s29  }
  0x53 PF: > { %s198_s24 = sand.u32 1, %s407_s6   ;;  %p602_p8 = scmp.ne.s32.totalorder %s599_s18, 0 }
  0x54   : > { %p603_p10 = scmp.ge.s32.totalorder %s419_s9, 2  ;;  %s199_s25 = scalar_lea.sflag [#allocation4], %s198_s24 }
  0x56   : > { %p282_p0 = pnand %p603_p10, %p602_p8 }
  0x58   : > { %402 = dma.done.wait (!%p282_p0), %s199_s25, 1536  }
  0x59   : > { %404 = vsyncadd (!%p282_p0), %s199_s25, 4294965760  ;;  %p14_p2 = scmp.ge.s32.totalorder %s462_s12, 4   ;;  %s604_s6 = smov %s411_s7 }
  0x5a   : > { %s605_s7 = smov %s415_s8  ;;  %s606_s8 = smov %s474_s15 }
  0x5b   : > { %s607_s9 = smov %s462_s12  ;;  %16 = sbr.rel (!%p14_p2) target bundleno = 5 (0x5), region = 69 }
  0x62   :  { %204 = vsyncpa [#allocation3], 1 }
  0x63   :  { %206 = vsyncpa [#allocation3 + $0x1], 1 }
  0x64   :  { %207 = vsyncpa [#allocation4], 1 }
  0x65   :  { %209 = vsyncpa [#allocation4 + $0x1], 1 }

</bundles_post_ra>
